<compile_context>
chip_gen: v7x
topology: tpu7x:2x2x1
jax: 0.10.0
libtpu: 0.0.40
codegen_flags: <defaults>
</compile_context>

<pallas_src>
import jax
import jax.numpy as jnp
from jax.experimental import pallas as pl
from jax.experimental.pallas import tpu as pltpu


# ------------------------------------------------------------------ kernel

def _conv1x1_kernel(x_ref, w_ref, b_ref, o_ref):
    # x_ref: (Bn, Cin, T)   activation block (spatial positions in lane dim)
    # w_ref: (Cout, Cin)    full 1x1 conv weight
    # b_ref: (Cout, 1)      bias
    # o_ref: (Bn, Cout, T)  output block (lane-dense store)
    w = w_ref[...]
    b = b_ref[...]
    # Bn is a small static block dimension (<= _MAX_BN): unroll over batch rows,
    # each row is a plain 2-D MXU matmul with the spatial dim on the lanes.
    for i in range(x_ref.shape[0]):
        y = jnp.dot(w, x_ref[i], preferred_element_type=jnp.float32)
        o_ref[i] = (y + b).astype(o_ref.dtype)


# ------------------------------------------------------------------ tiling

_LANE = 128
_VMEM_BUDGET = 24 << 20   # cap on double-buffered (in + out) block bytes
_MAX_BN = 8               # cap on batch rows folded per grid step (static unroll)


def _cdiv(a, b):
    return -(-a // b)


def _round_down(x, m):
    return (x // m) * m


def _round_up(x, m):
    return _cdiv(x, m) * m


def _plan_tiles(N, Cin, Cout, HW):
    """Pick (batch rows per block, spatial lanes per block)."""
    # f32 bytes per (batch row, lane) for double-buffered x + out blocks.
    per_row_lane = 2 * (Cin + Cout) * 4
    lane_budget = max(_LANE, _round_down(_VMEM_BUDGET // per_row_lane, _LANE))

    if HW <= _LANE:
        T = HW                                      # block == full spatial extent
    else:
        T = min(lane_budget, _round_down(HW, _LANE))  # multiple of 128, <= HW
    sp_tiles = _cdiv(HW, T)

    if sp_tiles == 1:
        # Whole spatial extent fits one tile: fold batch rows to amortize the
        # ~0.35 us per-grid-step overhead.
        Bn = min(N, _MAX_BN, max(1, _VMEM_BUDGET // (per_row_lane * T)))
    else:
        Bn = 1

    # Keep >= 2 grid steps whenever the problem allows (v7x has 2 TensorCores).
    if _cdiv(N, Bn) * _cdiv(HW, T) < 2:
        if N > 1:
            Bn = _cdiv(N, 2)
        elif HW > _LANE and T > _LANE:
            T = max(_LANE, _round_up(T // 2, _LANE))
    return Bn, T


# ------------------------------------------------------------------ wrapper

def conv1x1_nchw(x, w4, b):
    """1x1 conv, stride 1, no padding.
    x:  (N, Cin, H, W)      NCHW (PyTorch layout)
    w4: (Cout, Cin, 1, 1)   PyTorch Conv2d weight
    b:  (Cout,)             Conv2d bias
    returns (N, Cout, H, W)
    """
    N, Cin, H, W = x.shape
    Cout = w4.shape[0]
    HW = H * W

    w = w4.reshape(Cout, Cin)
    xf = x.reshape(N, Cin, HW)            # free relabeling, stays NCHW

    Bn, T = _plan_tiles(N, Cin, Cout, HW)
    grid = (_cdiv(N, Bn), _cdiv(HW, T))   # ragged tails handled by Pallas

    flops = 2 * N * Cout * Cin * HW
    bytes_accessed = (Cin + Cout) * N * HW * 4 + (Cout * Cin + Cout) * 4

    out = pl.pallas_call(
        _conv1x1_kernel,
        grid=grid,
        in_specs=[
            pl.BlockSpec((Bn, Cin, T), lambda n, t: (n, 0, t)),
            pl.BlockSpec((Cout, Cin), lambda n, t: (0, 0)),
            pl.BlockSpec((Cout, 1), lambda n, t: (0, 0)),
        ],
        out_specs=pl.BlockSpec((Bn, Cout, T), lambda n, t: (n, 0, t)),
        out_shape=jax.ShapeDtypeStruct((N, Cout, HW), x.dtype),
        compiler_params=pltpu.CompilerParams(
            dimension_semantics=("parallel", "parallel"),
            vmem_limit_bytes=48 << 20),
        cost_estimate=pl.CostEstimate(
            flops=flops, bytes_accessed=bytes_accessed, transcendentals=0),
    )(xf, w, b.reshape(Cout, 1))

    return out.reshape(N, Cout, H, W)


def r_block_forward(params, x):
    # R_Block.forward: y = Conv2d(in_c, 4, k=1, s=1)(x)
    return conv1x1_nchw(x, params["w"], params["b"])


# ------------------------------------------------------------------ params

def init_r_block(key, in_c, out_c=4):
    # PyTorch Conv2d default init: U(-1/sqrt(fan_in), 1/sqrt(fan_in)), fan_in = in_c
    kw, kb = jax.random.split(key)
    s = 1.0 / jnp.sqrt(jnp.float32(in_c))
    return {
        "w": jax.random.uniform(kw, (out_c, in_c, 1, 1), jnp.float32, -s, s),
        "b": jax.random.uniform(kb, (out_c,), jnp.float32, -s, s),
    }


# ------------------------------------------------------------------ main

if __name__ == "__main__":
    key = jax.random.PRNGKey(0)
    kx, kp = jax.random.split(key)

    N, in_c, H, W = 2, 4, 16, 16
    out_c = 4

    x = jax.random.normal(kx, (N, in_c, H, W), jnp.float32)
    params = init_r_block(kp, in_c, out_c)

    fwd = jax.jit(r_block_forward)
    out = jax.block_until_ready(fwd(params, x))

    assert out.shape == (N, out_c, H, W), out.shape
    assert bool(jnp.all(jnp.isfinite(out)))

    # numerical check against a pure-JAX reference of the same 1x1 conv
    ref = (jnp.einsum("nchw,oc->nohw", x, params["w"].reshape(out_c, in_c))
           + params["b"].reshape(1, out_c, 1, 1))
    assert bool(jnp.allclose(out, ref, rtol=1e-5, atol=1e-5))

    print("KERNEL_OK")
</pallas_src>

<mosaic_0001>
module attributes {stable_mosaic.version = 11 : i64} {
  func.func @_conv1x1_kernel(%arg0: i32, %arg1: i32, %arg2: memref<1x4x256xf32, #tpu.memory_space<vmem>>, %arg3: memref<4x4xf32, #tpu.memory_space<vmem>>, %arg4: memref<4x1xf32, #tpu.memory_space<vmem>>, %arg5: memref<1x4x256xf32, #tpu.memory_space<vmem>>) attributes {dimension_semantics = [#tpu.dimension_semantics<parallel>, #tpu.dimension_semantics<parallel>], iteration_bounds = array<i64: 2, 1>, scalar_prefetch = 0 : i64, scratch_operands = 0 : i64, tpu.core_type = #tpu.core_type<tc>, window_params = [{transform_indices = @transform_0, window_bounds = array<i64: 1, 4, 256>}, {pipeline_mode = #tpu.pipeline_mode<synchronous>, transform_indices = @transform_1, window_bounds = array<i64: 4, 4>}, {pipeline_mode = #tpu.pipeline_mode<synchronous>, transform_indices = @transform_2, window_bounds = array<i64: 4, 1>}, {transform_indices = @transform_3, window_bounds = array<i64: 1, 4, 256>}]} {
    %c0 = arith.constant 0 : index
    %c0_0 = arith.constant 0 : index
    %0 = vector.load %arg3[%c0, %c0_0] : memref<4x4xf32, #tpu.memory_space<vmem>>, vector<4x4xf32>
    %c0_1 = arith.constant 0 : index
    %c0_2 = arith.constant 0 : index
    %1 = vector.load %arg4[%c0_1, %c0_2] : memref<4x1xf32, #tpu.memory_space<vmem>>, vector<4x1xf32>
    %c0_3 = arith.constant 0 : index
    %c0_4 = arith.constant 0 : index
    %c0_5 = arith.constant 0 : index
    %2 = vector.load %arg2[%c0_3, %c0_4, %c0_5] : memref<1x4x256xf32, #tpu.memory_space<vmem>>, vector<1x4x256xf32>
    %3 = vector.shape_cast %2 : vector<1x4x256xf32> to vector<4x256xf32>
    %cst = arith.constant dense<0.000000e+00> : vector<4x256xf32>
    %4 = tpu.matmul %0, %3, %cst {dimension_numbers = #tpu.dot_dimension_numbers<[1], [0], [0], [1], [0, 0, 1, 1], [], []>} : vector<4x4xf32>, vector<4x256xf32>, vector<4x256xf32> -> vector<4x256xf32>
    %5 = vector.broadcast %1 : vector<4x1xf32> to vector<4x256xf32>
    %6 = arith.addf %4, %5 : vector<4x256xf32>
    %c0_6 = arith.constant 0 : index
    %c0_7 = arith.constant 0 : index
    %c0_8 = arith.constant 0 : index
    %7 = vector.load %arg5[%c0_6, %c0_7, %c0_8] : memref<1x4x256xf32, #tpu.memory_space<vmem>>, vector<1x4x256xf32>
    %8 = vector.shape_cast %7 : vector<1x4x256xf32> to vector<4x256xf32>
    %9 = vector.shape_cast %6 : vector<4x256xf32> to vector<1x4x256xf32>
    tpu.vector_store %arg5[%c0_6, %c0_7, %c0_8], %9 {strides = array<i32>} : memref<1x4x256xf32, #tpu.memory_space<vmem>>, vector<1x4x256xf32>,
    return
  }
  func.func @transform_0(%arg0: i32, %arg1: i32) -> (i32, i32, i32) {
    %c0_i32 = arith.constant 0 : i32
    %c0_i32_0 = arith.constant 0 : i32
    return %arg0, %c0_i32, %arg1 : i32, i32, i32
  }
  func.func @transform_1(%arg0: i32, %arg1: i32) -> (i32, i32) {
    %c0_i32 = arith.constant 0 : i32
    %c0_i32_0 = arith.constant 0 : i32
    %c0_i32_1 = arith.constant 0 : i32
    return %c0_i32, %c0_i32_0 : i32, i32
  }
  func.func @transform_2(%arg0: i32, %arg1: i32) -> (i32, i32) {
    %c0_i32 = arith.constant 0 : i32
    %c0_i32_0 = arith.constant 0 : i32
    %c0_i32_1 = arith.constant 0 : i32
    return %c0_i32, %c0_i32_0 : i32, i32
  }
  func.func @transform_3(%arg0: i32, %arg1: i32) -> (i32, i32, i32) {
    %c0_i32 = arith.constant 0 : i32
    %c0_i32_0 = arith.constant 0 : i32
    return %arg0, %c0_i32, %arg1 : i32, i32, i32
  }
}

</mosaic_0001>

<bundles_post_ra>
// kernel: r_block_forward.1
= control target key start
LH: loop header
LB: loop body
LE: loop exit
PB: predicated region body
PF: predicated region fallthrough
CT: control target
= control target key end

     0   :  { %s482_s12 = smov 0   ;;  %s484_s13 = smov 0   ;;  %s521_s0 = inlined_call_operand.vmem [shape: f32[2,4,256], index: 0, kind: input, shape index: {}]   ;;  %s522_s1 = inlined_call_operand.vmem [shape: f32[4,4], index: 1, kind: input, shape index: {}]   ;;  %s523_s2 = inlined_call_operand.vmem [shape: f32[4,1], index: 2, kind: input, shape index: {}]   ;;  %s524_s3 = inlined_call_operand.vmem [shape: f32[2,4,256], index: 3, kind: output, shape index: {}]  }
   0x1   :  { %s486_s14 = smov 0  }
   0x2 LB: > { %s25_s15 = sadd.s32 1, %s454_s13  ;;  %p396_p0 = scmp.ge.s32.totalorder %s458_s14, 1  ;;  %s458_s14 = sphi %s486_s14, %s13_s14   ;;  %s454_s13 = sphi %s484_s13, %s526_s13   ;;  %s450_s12 = sphi %s482_s12, %s525_s12  }
   0x3   : > { %p27_p1 = scmp.ge.s32.totalorder %s25_s15, 2  ;;  %p158_p2 = scmp.lt.s32.totalorder %s458_s14, 3 }
   0x5   : > { %s528_s15 = smov (%p27_p1, %s25_s15), 0  ;;  %p159_p3 = pnand %p396_p0, %p158_p2 }
   0x6   : > { %p191_p4 = scmp.lt.s32.totalorder (!%p159_p3), %s450_s12, 1  ;;  %v460_v0 = vmov (!%p159_p3), 0.0   ;;  %v211_v1 = vld [vmem:[%s523_s2] sm:$0xf] (!%p159_p3)  ;;  %v461_v2 = vmov (!%p159_p3), 0   ;;  %vm224_vm0 = vcmask (!%p159_p3), 1043456  }
   0x7   : > { %162 = sbr.rel (%p159_p3) target bundleno = 240 (0xf0), region = 32  ;;  %293 = vmatprep.mubr.f32.mxu0 (!%p159_p3), %v460_v0  ;;  %434 = vset.pattern.permute.xlu0 (!%p159_p3), %v461_v2  ;;  %v210_v5 = vld [vmem:[%s522_s1] sm:$0xf] (!%p159_p3)  ;;  %vm220_vm1 = vcmask (!%p159_p3), 31744  }
   0x8   : > { %215 = vperm.xlu0 (!%p159_p3), %434, %v211_v1  }
   0xe   : > { %s530_s12 = smov (!%p191_p4, %s450_s12), 1 }
   0xf   : > { %s406_s18 = sshll.u32 %s530_s12, 3 }
  0x10   : > { %s198_s21 = scalar_lea.vmem %s521_s0, %s406_s18  ;;  %s208_s26 = scalar_lea.vmem %s524_s3, %s406_s18 }
  0x11   : > { %v212_v3 = vld [vmem:[%s198_s21] sm:$0xff] }
  0x12   : > { %v219_v4 = vcombine.high %v212_v3, %v212_v3 }
  0x14   : > { %401 = vmatprep.subr.msk.mxu0 %vm224_vm0, %v219_v4 }
  0x15   : > { %402 = vmatpush1.msk.msra.mxu0 %vm224_vm0, %v212_v3 }
  0x16   : > { %403 = vmatmul.mubr.msk.f32.vlgmr.msra.gmra.mrb[0].mxu0 %vm220_vm1, %v210_v5 }
  0x87   : > { %v216_v6 = vpop.permute.xlu0 %215 }
  0xe9   : > { %v295_v7 = vpop.f32.mrb[0].mxu0 }
  0xea   : > { %v296_v8 = vadd.f32 %v295_v7, %v216_v6  ;;  %v297_v9 = vpop.f32.mrb[1].mxu0 }
  0xeb   : > { %v298_v10 = vadd.f32 %v297_v9, %v216_v6 }
  0xed   : > { %v302_v11 = vcombine.low %v296_v8, %v298_v10 }
  0xef   : > { %304 = vst [vmem:[%s208_s26] sm:$0xff] %v302_v11 }
  0xf0 PF: > { %s13_s14 = sadd.s32 1, %s458_s14   ;;  %s525_s12 = smov %s454_s13 }
  0xf1   : > { %p10_p5 = scmp.ge.s32.totalorder %s13_s14, 4   ;;  %s526_s13 = smov %s528_s15 }
  0xf3   :  { %12 = sbr.rel (!%p10_p5) target bundleno = 2 (0x2), region = 62 }

</bundles_post_ra>
